<compile_context>
chip_gen: v5e
topology: v5e:2x2
jax: 0.10.0
libtpu: 0.0.40
codegen_flags: <defaults>
</compile_context>

<pallas_src>
import functools
import math

import jax
import jax.numpy as jnp
from jax.experimental import pallas as pl
from jax.experimental.pallas import tpu as pltpu


def _physical_vmem_bytes():
    """Generation-aware physical VMEM (128 MiB v5e/v6e, 64 MiB v7x); safe fallback."""
    try:
        info = pltpu.get_tpu_info()
        return int(getattr(info, "vmem_capacity_bytes", 64 << 20))
    except Exception:
        return 64 << 20


def _qformer_kernel(qproj_ref, enc_ref, mask_ref, wk_ref, wv_ref, wd_ref, b_ref,
                    out_ref, ctx_ref, *, num_heads, head_dim, approx_recip):
    l = pl.program_id(1)

    qp = qproj_ref[0]                    # (Q, H)  bias + 1/sqrt(dh) folded, compute dtype
    enc = enc_ref[0]                     # (bb, S, E) compute dtype
    mask = mask_ref[0]                   # (bb, 1, S) f32 additive mask
    wk = wk_ref[0]                       # (E, H) compute dtype
    wv = wv_ref[0]                       # (E, H)
    wd = wd_ref[0]                       # (H, H)
    bk = b_ref[0, 0]                     # (H,) f32
    bv = b_ref[0, 1]                     # (H,)
    bd = b_ref[0, 2]                     # (H,)

    bb, S, E = enc.shape
    Q, H = qp.shape
    cdt = enc.dtype

    # K / V projections on flattened (bb*S, E) rows -> one big MXU matmul each per layer
    # (f32 accumulation), then cast back to the streaming dtype for the attention matmuls.
    enc2d = enc.reshape(bb * S, E)
    k = jnp.dot(enc2d, wk, preferred_element_type=jnp.float32) + bk
    v = jnp.dot(enc2d, wv, preferred_element_type=jnp.float32) + bv
    k = k.reshape(bb, S, H).astype(cdt)
    v = v.reshape(bb, S, H).astype(cdt)

    # Hoisted invariants: query broadcast over batch; mask broadcast over queries.
    qb = jnp.broadcast_to(qp[None], (bb, Q, H))
    mask_bqs = jnp.broadcast_to(mask, (bb, Q, S)).astype(jnp.float32)

    # Per-head attention. Each head's context goes into its lane slice of a (bb*Q, H)
    # VMEM scratch; the dense projection then runs as ONE (bb*Q, H) x (H, H) matmul
    # (K = H fills the MXU pipeline instead of nh tiny K = dh matmuls + accumulator churn).
    for h in range(num_heads):
        lo = h * head_dim
        hi = lo + head_dim
        qh = qb[:, :, lo:hi]                              # (bb, Q, dh)
        kh = k[:, :, lo:hi]                               # (bb, S, dh)
        vh = v[:, :, lo:hi]                               # (bb, S, dh)

        scores = jnp.einsum('bqd,bsd->bqs', qh, kh,
                            preferred_element_type=jnp.float32)   # (bb, Q, S) f32
        scores = scores + mask_bqs
        scores = scores - jnp.max(scores, axis=-1, keepdims=True)
        p = jnp.exp(scores)                                        # f32 softmax path
        denom = jnp.sum(p, axis=-1, keepdims=True)
        if approx_recip:
            p = p * pl.reciprocal(denom, approx=True)              # EUP slot
        else:
            p = p / denom

        ctx_h = jnp.einsum('bqs,bsd->bqd', p.astype(cdt), vh,
                           preferred_element_type=jnp.float32)     # (bb, Q, dh)
        ctx_ref[:, lo:hi] = ctx_h.reshape(bb * Q, head_dim).astype(ctx_ref.dtype)

    layer_out = jnp.dot(ctx_ref[...], wd, preferred_element_type=jnp.float32) + bd
    layer_out = layer_out.reshape(bb, Q, H)

    # First layer writes the resident output tile directly (no zero-fill + RMW);
    # later layers accumulate (output block is l-independent -> stays resident).
    @pl.when(l == 0)
    def _():
        out_ref[...] = layer_out

    @pl.when(l > 0)
    def _():
        out_ref[...] += layer_out


def simple_qformer(query_tokens, enc_states, enc_mask, params, *, num_heads,
                   batch_block=None, compute_dtype=jnp.float32,
                   approx_recip=True, vmem_limit_bytes=None):
    wq, bq, wk, bk, wv, bv, wd, bd = params
    L, B, S, E = enc_states.shape
    Q, H = query_tokens.shape
    head_dim = H // num_heads
    itemsize = jnp.dtype(compute_dtype).itemsize

    # Batch-independent query projection (bias and 1/sqrt(dh) folded in), done once in
    # the wrapper so Wq/bq never enter the kernel and B*L redundant matmuls disappear.
    q_proj = (jnp.einsum('qh,lhd->lqd', query_tokens, wq,
                         precision=jax.lax.Precision.HIGHEST) + bq) / math.sqrt(head_dim)
    q_proj = q_proj.astype(compute_dtype)

    enc_c = enc_states.astype(compute_dtype)
    wk_c = wk.astype(compute_dtype)
    wv_c = wv.astype(compute_dtype)
    wd_c = wd.astype(compute_dtype)
    mask_f32 = enc_mask.astype(jnp.float32)
    # Pack bk/bv/bd into one (L, 3, H) operand -> one small DMA per step instead of three.
    biases = jnp.concatenate([bk, bv, bd], axis=1).astype(jnp.float32)

    def est_vmem(bb):
        # Double-buffered streamed operands + live f32 intermediates for one grid step.
        enc_blk = bb * S * E * itemsize
        w_blk = (2 * E * H + H * H) * itemsize
        small = Q * H * itemsize + bb * S * 4 + 3 * H * 4
        out_blk = bb * Q * H * 4
        live = 2 * bb * S * H * 4 + bb * Q * S * 4 + 2 * bb * Q * H * 4
        return 2 * (enc_blk + w_blk + small + out_blk) + live

    phys_vmem = _physical_vmem_bytes()
    if batch_block is None:
        # Largest divisor of B whose working set fits ~60% of this generation's VMEM.
        # On v7x (2 TensorCores) pass batch_block=B//2 or smaller explicitly so that the
        # leading "parallel" grid axis actually maps onto both cores.
        budget = int(phys_vmem * 0.6)
        batch_block = 1
        for cand in range(B, 0, -1):
            if B % cand == 0 and est_vmem(cand) <= budget:
                batch_block = cand
                break
    assert B % batch_block == 0
    nb = B // batch_block

    if vmem_limit_bytes is None:
        vmem_limit_bytes = int(min(phys_vmem * 0.9,
                                   max(32 << 20, 2 * est_vmem(batch_block))))

    kernel = functools.partial(_qformer_kernel, num_heads=num_heads,
                               head_dim=head_dim, approx_recip=approx_recip)

    return pl.pallas_call(
        kernel,
        out_shape=jax.ShapeDtypeStruct((B, Q, H), jnp.float32),
        grid_spec=pltpu.PrefetchScalarGridSpec(
            num_scalar_prefetch=0,
            grid=(nb, L),
            in_specs=[
                pl.BlockSpec((1, Q, H), lambda bi, l: (l, 0, 0)),                   # q_proj
                pl.BlockSpec((1, batch_block, S, E), lambda bi, l: (l, bi, 0, 0)),  # enc
                pl.BlockSpec((1, batch_block, 1, S), lambda bi, l: (l, bi, 0, 0)),  # mask
                pl.BlockSpec((1, E, H), lambda bi, l: (l, 0, 0)),                   # Wk
                pl.BlockSpec((1, E, H), lambda bi, l: (l, 0, 0)),                   # Wv
                pl.BlockSpec((1, H, H), lambda bi, l: (l, 0, 0)),                   # Wd
                pl.BlockSpec((1, 3, H), lambda bi, l: (l, 0, 0)),                   # bk|bv|bd
            ],
            out_specs=pl.BlockSpec((batch_block, Q, H), lambda bi, l: (bi, 0, 0)),
            scratch_shapes=[pltpu.VMEM((batch_block * Q, H), compute_dtype)],
        ),
        compiler_params=pltpu.CompilerParams(
            dimension_semantics=("parallel", "arbitrary"),
            vmem_limit_bytes=vmem_limit_bytes),
    )(q_proj, enc_c, mask_f32, wk_c, wv_c, wd_c, biases)


def reference(query_tokens, enc_states, enc_mask, params, *, num_heads):
    """Pure-JAX reference matching the PyTorch forward semantics."""
    wq, bq, wk, bk, wv, bv, wd, bd = params
    L, B, S, E = enc_states.shape
    Q, H = query_tokens.shape
    dh = H // num_heads
    out = jnp.zeros((B, Q, H), jnp.float32)
    for l in range(L):
        q = query_tokens @ wq[l] + bq[l, 0]                          # (Q, H)
        k = enc_states[l] @ wk[l] + bk[l, 0]                         # (B, S, H)
        v = enc_states[l] @ wv[l] + bv[l, 0]                         # (B, S, H)
        qh = q.reshape(Q, num_heads, dh).transpose(1, 0, 2)          # (nh, Q, dh)
        kh = k.reshape(B, S, num_heads, dh).transpose(0, 2, 1, 3)    # (B, nh, S, dh)
        vh = v.reshape(B, S, num_heads, dh).transpose(0, 2, 1, 3)    # (B, nh, S, dh)
        scores = jnp.einsum('nqd,bnsd->bnqs', qh, kh) / math.sqrt(dh)
        scores = scores + enc_mask[l][:, None, :, :]                 # (B,1,1,S) broadcast
        probs = jax.nn.softmax(scores, axis=-1)
        ctx = jnp.einsum('bnqs,bnsd->bqnd', probs, vh).reshape(B, Q, H)
        out = out + ctx @ wd[l] + bd[l, 0]
    return out


if __name__ == "__main__":
    # Small config consistent with the module.
    L = 2          # num_layers
    B = 2          # batch
    S = 16         # encoder sequence length
    E = 64         # encoder_hidden_size
    H = 32         # hidden_size
    NH = 4         # num_attention_heads
    Q = 8          # num_query_tokens

    key = jax.random.PRNGKey(0)
    keys = jax.random.split(key, 9)

    # Deterministic parameter init (shapes from __init__; small random values instead of
    # torch's normal(0, 0.002)/zeros so the test exercises non-degenerate attention).
    query_tokens = jax.random.normal(keys[0], (Q, H), jnp.float32) * 0.02
    wq = jax.random.normal(keys[1], (L, H, H), jnp.float32) * 0.02
    wk = jax.random.normal(keys[2], (L, E, H), jnp.float32) * 0.02
    wv = jax.random.normal(keys[3], (L, E, H), jnp.float32) * 0.02
    wd = jax.random.normal(keys[4], (L, H, H), jnp.float32) * 0.02
    bq = jnp.zeros((L, 1, H), jnp.float32)
    bk = jnp.zeros((L, 1, H), jnp.float32)
    bv = jnp.zeros((L, 1, H), jnp.float32)
    bd = jnp.zeros((L, 1, H), jnp.float32)
    params = (wq, bq, wk, bk, wv, bv, wd, bd)

    enc_states = jax.random.normal(keys[5], (L, B, S, E), jnp.float32)
    keep = jax.random.bernoulli(keys[6], 0.8, (L, B, 1, S))
    enc_mask = jnp.where(keep, 0.0, -10000.0).astype(jnp.float32)

    ref = reference(query_tokens, enc_states, enc_mask, params, num_heads=NH)

    # f32 streaming path (tight-tolerance parity with the reference).
    out_f32 = simple_qformer(query_tokens, enc_states, enc_mask, params, num_heads=NH,
                             compute_dtype=jnp.float32)
    out_f32 = jax.block_until_ready(out_f32)
    assert out_f32.shape == (B, Q, H)
    assert jnp.allclose(out_f32, ref, atol=1e-4, rtol=1e-4), "f32 mismatch vs reference"

    # bf16 streaming path (production config: half the HBM/VMEM traffic, f32 accumulation).
    out_bf16 = simple_qformer(query_tokens, enc_states, enc_mask, params, num_heads=NH,
                              compute_dtype=jnp.bfloat16)
    out_bf16 = jax.block_until_ready(out_bf16)
    assert jnp.allclose(out_bf16, ref, atol=2e-2, rtol=2e-2), "bf16 mismatch vs reference"

    print("KERNEL_OK")
</pallas_src>

<mosaic_0001>
module attributes {stable_mosaic.version = 11 : i64} {
  func.func @_qformer_kernel(%arg0: i32, %arg1: i32, %arg2: memref<1x8x32xf32, #tpu.memory_space<vmem>>, %arg3: memref<1x2x16x64xf32, #tpu.memory_space<vmem>>, %arg4: memref<1x2x1x16xf32, #tpu.memory_space<vmem>>, %arg5: memref<1x64x32xf32, #tpu.memory_space<vmem>>, %arg6: memref<1x64x32xf32, #tpu.memory_space<vmem>>, %arg7: memref<1x32x32xf32, #tpu.memory_space<vmem>>, %arg8: memref<1x3x32xf32, #tpu.memory_space<vmem>>, %arg9: memref<2x8x32xf32, #tpu.memory_space<vmem>>, %arg10: memref<16x32xf32, #tpu.memory_space<vmem>>) attributes {dimension_semantics = [#tpu.dimension_semantics<parallel>, #tpu.dimension_semantics<arbitrary>], iteration_bounds = array<i64: 1, 2>, scalar_prefetch = 0 : i64, scratch_operands = 1 : i64, tpu.core_type = #tpu.core_type<tc>, window_params = [{transform_indices = @transform_0, window_bounds = array<i64: 1, 8, 32>}, {transform_indices = @transform_1, window_bounds = array<i64: 1, 2, 16, 64>}, {transform_indices = @transform_2, window_bounds = array<i64: 1, 2, 1, 16>}, {transform_indices = @transform_3, window_bounds = array<i64: 1, 64, 32>}, {transform_indices = @transform_4, window_bounds = array<i64: 1, 64, 32>}, {transform_indices = @transform_5, window_bounds = array<i64: 1, 32, 32>}, {transform_indices = @transform_6, window_bounds = array<i64: 1, 3, 32>}, {transform_indices = @transform_7, window_bounds = array<i64: 2, 8, 32>}]} {
    %c0 = arith.constant 0 : index
    %c0_0 = arith.constant 0 : index
    %c0_1 = arith.constant 0 : index
    %0 = vector.load %arg2[%c0, %c0_0, %c0_1] : memref<1x8x32xf32, #tpu.memory_space<vmem>>, vector<1x8x32xf32>
    %1 = vector.shape_cast %0 : vector<1x8x32xf32> to vector<8x32xf32>
    %c0_2 = arith.constant 0 : index
    %c0_3 = arith.constant 0 : index
    %c0_4 = arith.constant 0 : index
    %c0_5 = arith.constant 0 : index
    %2 = vector.load %arg3[%c0_2, %c0_3, %c0_4, %c0_5] : memref<1x2x16x64xf32, #tpu.memory_space<vmem>>, vector<1x2x16x64xf32>
    %3 = vector.shape_cast %2 : vector<1x2x16x64xf32> to vector<2x16x64xf32>
    %c0_6 = arith.constant 0 : index
    %c0_7 = arith.constant 0 : index
    %c0_8 = arith.constant 0 : index
    %c0_9 = arith.constant 0 : index
    %4 = vector.load %arg4[%c0_6, %c0_7, %c0_8, %c0_9] : memref<1x2x1x16xf32, #tpu.memory_space<vmem>>, vector<1x2x1x16xf32>
    %5 = vector.shape_cast %4 : vector<1x2x1x16xf32> to vector<2x1x16xf32>
    %c0_10 = arith.constant 0 : index
    %c0_11 = arith.constant 0 : index
    %c0_12 = arith.constant 0 : index
    %6 = vector.load %arg5[%c0_10, %c0_11, %c0_12] : memref<1x64x32xf32, #tpu.memory_space<vmem>>, vector<1x64x32xf32>
    %7 = vector.shape_cast %6 : vector<1x64x32xf32> to vector<64x32xf32>
    %c0_13 = arith.constant 0 : index
    %c0_14 = arith.constant 0 : index
    %c0_15 = arith.constant 0 : index
    %8 = vector.load %arg6[%c0_13, %c0_14, %c0_15] : memref<1x64x32xf32, #tpu.memory_space<vmem>>, vector<1x64x32xf32>
    %9 = vector.shape_cast %8 : vector<1x64x32xf32> to vector<64x32xf32>
    %c0_16 = arith.constant 0 : index
    %c0_17 = arith.constant 0 : index
    %c0_18 = arith.constant 0 : index
    %10 = vector.load %arg7[%c0_16, %c0_17, %c0_18] : memref<1x32x32xf32, #tpu.memory_space<vmem>>, vector<1x32x32xf32>
    %11 = vector.shape_cast %10 : vector<1x32x32xf32> to vector<32x32xf32>
    %c0_19 = arith.constant 0 : index
    %c0_20 = arith.constant 0 : index
    %c0_21 = arith.constant 0 : index
    %12 = vector.load %arg8[%c0_19, %c0_20, %c0_21] : memref<1x3x32xf32, #tpu.memory_space<vmem>>, vector<1x1x32xf32>
    %13 = vector.shape_cast %12 : vector<1x1x32xf32> to vector<32xf32>
    %c0_22 = arith.constant 0 : index
    %c1 = arith.constant 1 : index
    %c0_23 = arith.constant 0 : index
    %14 = vector.load %arg8[%c0_22, %c1, %c0_23] : memref<1x3x32xf32, #tpu.memory_space<vmem>>, vector<1x1x32xf32>
    %15 = vector.shape_cast %14 : vector<1x1x32xf32> to vector<32xf32>
    %c0_24 = arith.constant 0 : index
    %c2 = arith.constant 2 : index
    %c0_25 = arith.constant 0 : index
    %16 = vector.load %arg8[%c0_24, %c2, %c0_25] : memref<1x3x32xf32, #tpu.memory_space<vmem>>, vector<1x1x32xf32>
    %17 = vector.shape_cast %16 : vector<1x1x32xf32> to vector<32xf32>
    %18 = vector.shape_cast %3 : vector<2x16x64xf32> to vector<32x64xf32>
    %cst = arith.constant dense<0.000000e+00> : vector<32x32xf32>
    %19 = tpu.matmul %18, %7, %cst {dimension_numbers = #tpu.dot_dimension_numbers<[1], [0], [0], [1], [0, 0, 1, 1], [], []>} : vector<32x64xf32>, vector<64x32xf32>, vector<32x32xf32> -> vector<32x32xf32>
    %20 = vector.shape_cast %13 : vector<32xf32> to vector<1x32xf32>
    %21 = vector.broadcast %20 : vector<1x32xf32> to vector<32x32xf32>
    %22 = arith.addf %19, %21 : vector<32x32xf32>
    %cst_26 = arith.constant dense<0.000000e+00> : vector<32x32xf32>
    %23 = tpu.matmul %18, %9, %cst_26 {dimension_numbers = #tpu.dot_dimension_numbers<[1], [0], [0], [1], [0, 0, 1, 1], [], []>} : vector<32x64xf32>, vector<64x32xf32>, vector<32x32xf32> -> vector<32x32xf32>
    %24 = vector.shape_cast %15 : vector<32xf32> to vector<1x32xf32>
    %25 = vector.broadcast %24 : vector<1x32xf32> to vector<32x32xf32>
    %26 = arith.addf %23, %25 : vector<32x32xf32>
    %27 = vector.shape_cast %22 : vector<32x32xf32> to vector<2x16x32xf32>
    %28 = vector.shape_cast %26 : vector<32x32xf32> to vector<2x16x32xf32>
    %29 = vector.shape_cast %1 : vector<8x32xf32> to vector<1x8x32xf32>
    %30 = vector.shape_cast %29 : vector<1x8x32xf32> to vector<1x8x32xf32>
    %31 = vector.broadcast %30 : vector<1x8x32xf32> to vector<2x8x32xf32>
    %32 = vector.shape_cast %5 : vector<2x1x16xf32> to vector<2x1x16xf32>
    %33 = vector.broadcast %32 : vector<2x1x16xf32> to vector<2x8x16xf32>
    %34 = vector.extract_strided_slice %31 {offsets = [0, 0, 0], sizes = [2, 8, 8], strides = [1, 1, 1]} : vector<2x8x32xf32> to vector<2x8x8xf32>
    %35 = vector.extract_strided_slice %27 {offsets = [0, 0, 0], sizes = [2, 16, 8], strides = [1, 1, 1]} : vector<2x16x32xf32> to vector<2x16x8xf32>
    %36 = vector.extract_strided_slice %28 {offsets = [0, 0, 0], sizes = [2, 16, 8], strides = [1, 1, 1]} : vector<2x16x32xf32> to vector<2x16x8xf32>
    "tpu.trace_start"() <{level = 10 : i32, message = "bqd,bsd->bqs"}> : () -> ()
    %cst_27 = arith.constant dense<0.000000e+00> : vector<2x8x16xf32>
    %37 = tpu.matmul %34, %35, %cst_27 {dimension_numbers = #tpu.dot_dimension_numbers<[2], [2], [1], [1], [0, 0, 0, 1, 1, 1], [0], [0]>} : vector<2x8x8xf32>, vector<2x16x8xf32>, vector<2x8x16xf32> -> vector<2x8x16xf32>
    "tpu.trace_stop"() : () -> ()
    %38 = arith.addf %37, %33 : vector<2x8x16xf32>
    %cst_28 = arith.constant dense<0xFF800000> : vector<2x8xf32>
    %39 = vector.multi_reduction <maximumf>, %38, %cst_28 [2] : vector<2x8x16xf32> to vector<2x8xf32>
    %40 = vector.shape_cast %39 : vector<2x8xf32> to vector<2x8x1xf32>
    %41 = vector.broadcast %40 : vector<2x8x1xf32> to vector<2x8x16xf32>
    %42 = arith.subf %38, %41 : vector<2x8x16xf32>
    %43 = math.exp %42 : vector<2x8x16xf32>
    %cst_29 = arith.constant dense<0.000000e+00> : vector<2x8xf32>
    %44 = vector.multi_reduction <add>, %43, %cst_29 [2] : vector<2x8x16xf32> to vector<2x8xf32>
    %45 = vector.shape_cast %44 : vector<2x8xf32> to vector<2x8x1xf32>
    %46 = tpu.reciprocal %45 {approx = true} : vector<2x8x1xf32> -> vector<2x8x1xf32>
    %47 = vector.broadcast %46 : vector<2x8x1xf32> to vector<2x8x16xf32>
    %48 = arith.mulf %43, %47 : vector<2x8x16xf32>
    "tpu.trace_start"() <{level = 10 : i32, message = "bqs,bsd->bqd"}> : () -> ()
    %cst_30 = arith.constant dense<0.000000e+00> : vector<2x8x8xf32>
    %49 = tpu.matmul %48, %36, %cst_30 {dimension_numbers = #tpu.dot_dimension_numbers<[2], [1], [1], [2], [0, 0, 0, 1, 1, 2], [0], [0]>} : vector<2x8x16xf32>, vector<2x16x8xf32>, vector<2x8x8xf32> -> vector<2x8x8xf32>
    "tpu.trace_stop"() : () -> ()
    %50 = vector.shape_cast %49 : vector<2x8x8xf32> to vector<16x8xf32>
    %c0_31 = arith.constant 0 : index
    %c0_32 = arith.constant 0 : index
    %51 = vector.load %arg10[%c0_31, %c0_32] : memref<16x32xf32, #tpu.memory_space<vmem>>, vector<16x8xf32>
    tpu.vector_store %arg10[%c0_31, %c0_32], %50 {strides = array<i32>} : memref<16x32xf32, #tpu.memory_space<vmem>>, vector<16x8xf32>,
    %52 = vector.extract_strided_slice %31 {offsets = [0, 0, 8], sizes = [2, 8, 8], strides = [1, 1, 1]} : vector<2x8x32xf32> to vector<2x8x8xf32>
    %53 = vector.extract_strided_slice %27 {offsets = [0, 0, 8], sizes = [2, 16, 8], strides = [1, 1, 1]} : vector<2x16x32xf32> to vector<2x16x8xf32>
    %54 = vector.extract_strided_slice %28 {offsets = [0, 0, 8], sizes = [2, 16, 8], strides = [1, 1, 1]} : vector<2x16x32xf32> to vector<2x16x8xf32>
    "tpu.trace_start"() <{level = 10 : i32, message = "bqd,bsd->bqs"}> : () -> ()
    %cst_33 = arith.constant dense<0.000000e+00> : vector<2x8x16xf32>
    %55 = tpu.matmul %52, %53, %cst_33 {dimension_numbers = #tpu.dot_dimension_numbers<[2], [2], [1], [1], [0, 0, 0, 1, 1, 1], [0], [0]>} : vector<2x8x8xf32>, vector<2x16x8xf32>, vector<2x8x16xf32> -> vector<2x8x16xf32>
    "tpu.trace_stop"() : () -> ()
    %56 = arith.addf %55, %33 : vector<2x8x16xf32>
    %cst_34 = arith.constant dense<0xFF800000> : vector<2x8xf32>
    %57 = vector.multi_reduction <maximumf>, %56, %cst_34 [2] : vector<2x8x16xf32> to vector<2x8xf32>
    %58 = vector.shape_cast %57 : vector<2x8xf32> to vector<2x8x1xf32>
    %59 = vector.broadcast %58 : vector<2x8x1xf32> to vector<2x8x16xf32>
    %60 = arith.subf %56, %59 : vector<2x8x16xf32>
    %61 = math.exp %60 : vector<2x8x16xf32>
    %cst_35 = arith.constant dense<0.000000e+00> : vector<2x8xf32>
    %62 = vector.multi_reduction <add>, %61, %cst_35 [2] : vector<2x8x16xf32> to vector<2x8xf32>
    %63 = vector.shape_cast %62 : vector<2x8xf32> to vector<2x8x1xf32>
    %64 = tpu.reciprocal %63 {approx = true} : vector<2x8x1xf32> -> vector<2x8x1xf32>
    %65 = vector.broadcast %64 : vector<2x8x1xf32> to vector<2x8x16xf32>
    %66 = arith.mulf %61, %65 : vector<2x8x16xf32>
    "tpu.trace_start"() <{level = 10 : i32, message = "bqs,bsd->bqd"}> : () -> ()
    %cst_36 = arith.constant dense<0.000000e+00> : vector<2x8x8xf32>
    %67 = tpu.matmul %66, %54, %cst_36 {dimension_numbers = #tpu.dot_dimension_numbers<[2], [1], [1], [2], [0, 0, 0, 1, 1, 2], [0], [0]>} : vector<2x8x16xf32>, vector<2x16x8xf32>, vector<2x8x8xf32> -> vector<2x8x8xf32>
    "tpu.trace_stop"() : () -> ()
    %68 = vector.shape_cast %67 : vector<2x8x8xf32> to vector<16x8xf32>
    %c0_37 = arith.constant 0 : index
    %c8 = arith.constant 8 : index
    %69 = vector.load %arg10[%c0_37, %c8] : memref<16x32xf32, #tpu.memory_space<vmem>>, vector<16x8xf32>
    tpu.vector_store %arg10[%c0_37, %c8], %68 {strides = array<i32>} : memref<16x32xf32, #tpu.memory_space<vmem>>, vector<16x8xf32>,
    %70 = vector.extract_strided_slice %31 {offsets = [0, 0, 16], sizes = [2, 8, 8], strides = [1, 1, 1]} : vector<2x8x32xf32> to vector<2x8x8xf32>
    %71 = vector.extract_strided_slice %27 {offsets = [0, 0, 16], sizes = [2, 16, 8], strides = [1, 1, 1]} : vector<2x16x32xf32> to vector<2x16x8xf32>
    %72 = vector.extract_strided_slice %28 {offsets = [0, 0, 16], sizes = [2, 16, 8], strides = [1, 1, 1]} : vector<2x16x32xf32> to vector<2x16x8xf32>
    "tpu.trace_start"() <{level = 10 : i32, message = "bqd,bsd->bqs"}> : () -> ()
    %cst_38 = arith.constant dense<0.000000e+00> : vector<2x8x16xf32>
    %73 = tpu.matmul %70, %71, %cst_38 {dimension_numbers = #tpu.dot_dimension_numbers<[2], [2], [1], [1], [0, 0, 0, 1, 1, 1], [0], [0]>} : vector<2x8x8xf32>, vector<2x16x8xf32>, vector<2x8x16xf32> -> vector<2x8x16xf32>
    "tpu.trace_stop"() : () -> ()
    %74 = arith.addf %73, %33 : vector<2x8x16xf32>
    %cst_39 = arith.constant dense<0xFF800000> : vector<2x8xf32>
    %75 = vector.multi_reduction <maximumf>, %74, %cst_39 [2] : vector<2x8x16xf32> to vector<2x8xf32>
    %76 = vector.shape_cast %75 : vector<2x8xf32> to vector<2x8x1xf32>
    %77 = vector.broadcast %76 : vector<2x8x1xf32> to vector<2x8x16xf32>
    %78 = arith.subf %74, %77 : vector<2x8x16xf32>
    %79 = math.exp %78 : vector<2x8x16xf32>
    %cst_40 = arith.constant dense<0.000000e+00> : vector<2x8xf32>
    %80 = vector.multi_reduction <add>, %79, %cst_40 [2] : vector<2x8x16xf32> to vector<2x8xf32>
    %81 = vector.shape_cast %80 : vector<2x8xf32> to vector<2x8x1xf32>
    %82 = tpu.reciprocal %81 {approx = true} : vector<2x8x1xf32> -> vector<2x8x1xf32>
    %83 = vector.broadcast %82 : vector<2x8x1xf32> to vector<2x8x16xf32>
    %84 = arith.mulf %79, %83 : vector<2x8x16xf32>
    "tpu.trace_start"() <{level = 10 : i32, message = "bqs,bsd->bqd"}> : () -> ()
    %cst_41 = arith.constant dense<0.000000e+00> : vector<2x8x8xf32>
    %85 = tpu.matmul %84, %72, %cst_41 {dimension_numbers = #tpu.dot_dimension_numbers<[2], [1], [1], [2], [0, 0, 0, 1, 1, 2], [0], [0]>} : vector<2x8x16xf32>, vector<2x16x8xf32>, vector<2x8x8xf32> -> vector<2x8x8xf32>
    "tpu.trace_stop"() : () -> ()
    %86 = vector.shape_cast %85 : vector<2x8x8xf32> to vector<16x8xf32>
    %c0_42 = arith.constant 0 : index
    %c16 = arith.constant 16 : index
    %87 = vector.load %arg10[%c0_42, %c16] : memref<16x32xf32, #tpu.memory_space<vmem>>, vector<16x8xf32>
    tpu.vector_store %arg10[%c0_42, %c16], %86 {strides = array<i32>} : memref<16x32xf32, #tpu.memory_space<vmem>>, vector<16x8xf32>,
    %88 = vector.extract_strided_slice %31 {offsets = [0, 0, 24], sizes = [2, 8, 8], strides = [1, 1, 1]} : vector<2x8x32xf32> to vector<2x8x8xf32>
    %89 = vector.extract_strided_slice %27 {offsets = [0, 0, 24], sizes = [2, 16, 8], strides = [1, 1, 1]} : vector<2x16x32xf32> to vector<2x16x8xf32>
    %90 = vector.extract_strided_slice %28 {offsets = [0, 0, 24], sizes = [2, 16, 8], strides = [1, 1, 1]} : vector<2x16x32xf32> to vector<2x16x8xf32>
    "tpu.trace_start"() <{level = 10 : i32, message = "bqd,bsd->bqs"}> : () -> ()
    %cst_43 = arith.constant dense<0.000000e+00> : vector<2x8x16xf32>
    %91 = tpu.matmul %88, %89, %cst_43 {dimension_numbers = #tpu.dot_dimension_numbers<[2], [2], [1], [1], [0, 0, 0, 1, 1, 1], [0], [0]>} : vector<2x8x8xf32>, vector<2x16x8xf32>, vector<2x8x16xf32> -> vector<2x8x16xf32>
    "tpu.trace_stop"() : () -> ()
    %92 = arith.addf %91, %33 : vector<2x8x16xf32>
    %cst_44 = arith.constant dense<0xFF800000> : vector<2x8xf32>
    %93 = vector.multi_reduction <maximumf>, %92, %cst_44 [2] : vector<2x8x16xf32> to vector<2x8xf32>
    %94 = vector.shape_cast %93 : vector<2x8xf32> to vector<2x8x1xf32>
    %95 = vector.broadcast %94 : vector<2x8x1xf32> to vector<2x8x16xf32>
    %96 = arith.subf %92, %95 : vector<2x8x16xf32>
    %97 = math.exp %96 : vector<2x8x16xf32>
    %cst_45 = arith.constant dense<0.000000e+00> : vector<2x8xf32>
    %98 = vector.multi_reduction <add>, %97, %cst_45 [2] : vector<2x8x16xf32> to vector<2x8xf32>
    %99 = vector.shape_cast %98 : vector<2x8xf32> to vector<2x8x1xf32>
    %100 = tpu.reciprocal %99 {approx = true} : vector<2x8x1xf32> -> vector<2x8x1xf32>
    %101 = vector.broadcast %100 : vector<2x8x1xf32> to vector<2x8x16xf32>
    %102 = arith.mulf %97, %101 : vector<2x8x16xf32>
    "tpu.trace_start"() <{level = 10 : i32, message = "bqs,bsd->bqd"}> : () -> ()
    %cst_46 = arith.constant dense<0.000000e+00> : vector<2x8x8xf32>
    %103 = tpu.matmul %102, %90, %cst_46 {dimension_numbers = #tpu.dot_dimension_numbers<[2], [1], [1], [2], [0, 0, 0, 1, 1, 2], [0], [0]>} : vector<2x8x16xf32>, vector<2x16x8xf32>, vector<2x8x8xf32> -> vector<2x8x8xf32>
    "tpu.trace_stop"() : () -> ()
    %104 = vector.shape_cast %103 : vector<2x8x8xf32> to vector<16x8xf32>
    %c0_47 = arith.constant 0 : index
    %c24 = arith.constant 24 : index
    %105 = vector.load %arg10[%c0_47, %c24] : memref<16x32xf32, #tpu.memory_space<vmem>>, vector<16x8xf32>
    tpu.vector_store %arg10[%c0_47, %c24], %104 {strides = array<i32>} : memref<16x32xf32, #tpu.memory_space<vmem>>, vector<16x8xf32>,
    %c0_48 = arith.constant 0 : index
    %c0_49 = arith.constant 0 : index
    %106 = vector.load %arg10[%c0_48, %c0_49] : memref<16x32xf32, #tpu.memory_space<vmem>>, vector<16x32xf32>
    %cst_50 = arith.constant dense<0.000000e+00> : vector<16x32xf32>
    %107 = tpu.matmul %106, %11, %cst_50 {dimension_numbers = #tpu.dot_dimension_numbers<[1], [0], [0], [1], [0, 0, 1, 1], [], []>} : vector<16x32xf32>, vector<32x32xf32>, vector<16x32xf32> -> vector<16x32xf32>
    %108 = vector.shape_cast %17 : vector<32xf32> to vector<1x32xf32>
    %109 = vector.broadcast %108 : vector<1x32xf32> to vector<16x32xf32>
    %110 = arith.addf %107, %109 : vector<16x32xf32>
    %111 = vector.shape_cast %110 : vector<16x32xf32> to vector<2x8x32xf32>
    %c0_i32 = arith.constant 0 : i32
    %112 = arith.cmpi eq, %arg1, %c0_i32 : i32
    %113 = arith.extui %112 : i1 to i32
    %c0_i32_51 = arith.constant 0 : i32
    %114 = arith.cmpi ne, %113, %c0_i32_51 : i32
    scf.if %114 {
      %c0_54 = arith.constant 0 : index
      %c0_55 = arith.constant 0 : index
      %c0_56 = arith.constant 0 : index
      %118 = vector.load %arg9[%c0_54, %c0_55, %c0_56] : memref<2x8x32xf32, #tpu.memory_space<vmem>>, vector<2x8x32xf32>
      tpu.vector_store %arg9[%c0_54, %c0_55, %c0_56], %111 {strides = array<i32>} : memref<2x8x32xf32, #tpu.memory_space<vmem>>, vector<2x8x32xf32>,
    } else {
    }
    %c0_i32_52 = arith.constant 0 : i32
    %115 = arith.cmpi sgt, %arg1, %c0_i32_52 : i32
    %116 = arith.extui %115 : i1 to i32
    %c0_i32_53 = arith.constant 0 : i32
    %117 = arith.cmpi ne, %116, %c0_i32_53 : i32
    scf.if %117 {
      %c0_54 = arith.constant 0 : index
      %c0_55 = arith.constant 0 : index
      %c0_56 = arith.constant 0 : index
      %118 = vector.load %arg9[%c0_54, %c0_55, %c0_56] : memref<2x8x32xf32, #tpu.memory_space<vmem>>, vector<2x8x32xf32>
      %119 = arith.addf %118, %111 : vector<2x8x32xf32>
      %c0_57 = arith.constant 0 : index
      %c0_58 = arith.constant 0 : index
      %c0_59 = arith.constant 0 : index
      %120 = vector.load %arg9[%c0_57, %c0_58, %c0_59] : memref<2x8x32xf32, #tpu.memory_space<vmem>>, vector<2x8x32xf32>
      tpu.vector_store %arg9[%c0_57, %c0_58, %c0_59], %119 {strides = array<i32>} : memref<2x8x32xf32, #tpu.memory_space<vmem>>, vector<2x8x32xf32>,
    } else {
    }
    return
  }
  func.func @transform_0(%arg0: i32, %arg1: i32) -> (i32, i32, i32) {
    %c0_i32 = arith.constant 0 : i32
    %c0_i32_0 = arith.constant 0 : i32
    %c0_i32_1 = arith.constant 0 : i32
    return %arg1, %c0_i32, %c0_i32_0 : i32, i32, i32
  }
  func.func @transform_1(%arg0: i32, %arg1: i32) -> (i32, i32, i32, i32) {
    %c0_i32 = arith.constant 0 : i32
    %c0_i32_0 = arith.constant 0 : i32
    %c0_i32_1 = arith.constant 0 : i32
    return %arg1, %arg0, %c0_i32, %c0_i32_0 : i32, i32, i32, i32
  }
  func.func @transform_2(%arg0: i32, %arg1: i32) -> (i32, i32, i32, i32) {
    %c0_i32 = arith.constant 0 : i32
    %c0_i32_0 = arith.constant 0 : i32
    %c0_i32_1 = arith.constant 0 : i32
    return %arg1, %arg0, %c0_i32, %c0_i32_0 : i32, i32, i32, i32
  }
  func.func @transform_3(%arg0: i32, %arg1: i32) -> (i32, i32, i32) {
    %c0_i32 = arith.constant 0 : i32
    %c0_i32_0 = arith.constant 0 : i32
    %c0_i32_1 = arith.constant 0 : i32
    return %arg1, %c0_i32, %c0_i32_0 : i32, i32, i32
  }
  func.func @transform_4(%arg0: i32, %arg1: i32) -> (i32, i32, i32) {
    %c0_i32 = arith.constant 0 : i32
    %c0_i32_0 = arith.constant 0 : i32
    %c0_i32_1 = arith.constant 0 : i32
    return %arg1, %c0_i32, %c0_i32_0 : i32, i32, i32
  }
  func.func @transform_5(%arg0: i32, %arg1: i32) -> (i32, i32, i32) {
    %c0_i32 = arith.constant 0 : i32
    %c0_i32_0 = arith.constant 0 : i32
    %c0_i32_1 = arith.constant 0 : i32
    return %arg1, %c0_i32, %c0_i32_0 : i32, i32, i32
  }
  func.func @transform_6(%arg0: i32, %arg1: i32) -> (i32, i32, i32) {
    %c0_i32 = arith.constant 0 : i32
    %c0_i32_0 = arith.constant 0 : i32
    %c0_i32_1 = arith.constant 0 : i32
    return %arg1, %c0_i32, %c0_i32_0 : i32, i32, i32
  }
  func.func @transform_7(%arg0: i32, %arg1: i32) -> (i32, i32, i32) {
    %c0_i32 = arith.constant 0 : i32
    %c0_i32_0 = arith.constant 0 : i32
    %c0_i32_1 = arith.constant 0 : i32
    return %arg0, %c0_i32, %c0_i32_0 : i32, i32, i32
  }
}

</mosaic_0001>

<bundles_post_ra>
// kernel: tpu_custom_call.1
= control target key start
LH: loop header
LB: loop body
LE: loop exit
PB: predicated region body
PF: predicated region fallthrough
CT: control target
= control target key end

     0   :  { %12 = vsyncpa [#allocation4], 0  ;;  %s1595_s24 = smov 0   ;;  %s1597_s25 = smov 0   ;;  %s1831_s0 = inlined_call_operand.vmem [shape: f32[2,8,32], index: 0, kind: input, shape index: {}]   ;;  %s1832_s1 = inlined_call_operand.vmem [shape: f32[2,2,16,64], index: 1, kind: input, shape index: {}]   ;;  %s1833_s2 = inlined_call_operand.vmem [shape: f32[2,2,1,16], index: 2, kind: input, shape index: {}]   ;;  %s1834_s3 = inlined_call_operand.vmem [shape: f32[2,64,32], index: 3, kind: input, shape index: {}]   ;;  %s1835_s4 = inlined_call_operand.vmem [shape: f32[2,64,32], index: 4, kind: input, shape index: {}]   ;;  %s1836_s5 = inlined_call_operand.vmem [shape: f32[2,32,32], index: 5, kind: input, shape index: {}]   ;;  %s1837_s6 = inlined_call_operand.vmem [shape: f32[2,3,32], index: 6, kind: input, shape index: {}]   ;;  %s1838_s7 = inlined_call_operand.hbm [shape: f32[2,8,32], index: 7, kind: output, shape index: {}]  }
   0x1   :  { %s1599_s26 = smov 0  }
   0x2 LB: > { %s1319_s27 = sadd.s32 4294967295, %s1545_s26   ;;  %s27_s28 = sadd.s32 1, %s1541_s25  ;;  %s1545_s26 = sphi %s1599_s26, %s18_s26   ;;  %s1541_s25 = sphi %s1597_s25, %s1840_s25   ;;  %s1537_s24 = sphi %s1595_s24, %s1839_s24  }
   0x3   : > { %p28_p0 = scmp.ge.s32.totalorder %s27_s28, 2  ;;  %p1322_p1 = scmp.ge.s32.totalorder %s1545_s26, 1 }
   0x4   : > { %p322_p2 = scmp.lt.s32.totalorder %s1545_s26, 3 }
   0x5   : > { %s1842_s28 = smov (%p28_p0, %s27_s28), 0 }
   0x6   : > { %p323_p3 = pnand %p1322_p1, %p322_p2 }
   0x7   : > { %p385_p4 = scmp.lt.s32.totalorder (!%p323_p3), %s1537_s24, 1  ;;  %s1548_s15 = smov (!%p323_p3), 112  }
   0x8   : > { %326 = sbr.rel (%p323_p3) target bundleno = 1819 (0x71b), region = 48  ;;  %s1549_s16 = smov (!%p323_p3), 104  }
   0x9   : > { %s1551_s19 = smov (!%p323_p3), 16   ;;  %s1552_s20 = smov (!%p323_p3), 24  }
   0xa   : > { %p1376_p5 = scmp.ne.s32.totalorder (!%p323_p3), %s1537_s24, 0 }
   0xd   : > { %s1618_s29 = scalar_select %p385_p4, %s1537_s24, 1  ;;  %vm460_vm0 = vcmask 523264   ;;  %vm538_vm1 = vcmask 64512   ;;  %vm594_vm2 = vcmask 130048   ;;  %vm817_vm3 = vcmask 130112  }
   0xe   : > { %vm968_vm4 = vcmask 195712   ;;  %vm1119_vm5 = vcmask 261312   ;;  %vm1125_vm6 = vcmask 261120  }
   0xf   : > { %s1383_s30 = sshll.u32 %s1618_s29, 6  ;;  %s1333_s11 = sshll.u32 %s1618_s29, 2 }
  0x10   : > { %s413_s10 = scalar_lea.vmem %s1834_s3, %s1383_s30  ;;  %s1628_s14 = scalar_lea.vmem %s1837_s6, %s1333_s11 }
  0x11   : > { %v443_v0 = vld [vmem:[%s413_s10 + $0x38] sm:$0xff]  ;;  %v442_v1 = vld [vmem:[%s413_s10 + $0x30] sm:$0xff]  ;;  %v441_v2 = vld [vmem:[%s413_s10 + $0x28] sm:$0xff]  ;;  %s418_s17 = scalar_lea.vmem %s1835_s4, %s1383_s30  ;;  %s1382_s18 = sshll.u32 %s1618_s29, 5 }
  0x12   : > { %481 = vmatpush.msra.mxu0 %v443_v0  ;;  %v440_v3 = vld [vmem:[%s413_s10 + $0x20] sm:$0xff]  ;;  %v439_v4 = vld [vmem:[%s413_s10 + $0x18] sm:$0xff]  ;;  %v438_v5 = vld [vmem:[%s413_s10 + $0x10] sm:$0xff]  ;;  %s398_s21 = scalar_lea.vmem %s1832_s1, %s1382_s18  ;;  %s1326_s22 = sshll.u32 %s1618_s29, 1 }
  0x13   : > { %v451_v6 = vld [vmem:[%s418_s17 + $0x38] sm:$0xff]  ;;  %v450_v7 = vld [vmem:[%s418_s17 + $0x30] sm:$0xff]  ;;  %v437_v8 = vld [vmem:[%s413_s10 + $0x8] sm:$0xff]  ;;  %s1651_s8 = scalar_lea.vmem %s1833_s2, %s1326_s22  ;;  %s1323_s9 = sshll.u32 %s1618_s29, 3 }
  0x14   : > { %482 = vmatpush.msra.mxu0 %v442_v1  ;;  %511 = vmatpush.msra.mxu1 %v451_v6  ;;  %v449_v9 = vld [vmem:[%s418_s17 + $0x28] sm:$0xff]  ;;  %v436_v10 = vld [vmem:[%s413_s10] sm:$0xff]  ;;  %v447_v13 = vld [vmem:[%s418_s17 + $0x18] sm:$0xff]  ;;  %s1547_s10 = smov 120   ;;  %s388_s13 = scalar_lea.vmem %s1831_s0, %s1323_s9 }
  0x15   : > { %v448_v11 = vld [vmem:[%s418_s17 + $0x20] sm:$0xff]  ;;  %v446_v14 = vld [vmem:[%s418_s17 + $0x10] sm:$0xff]  ;;  %v445_v15 = vld [vmem:[%s418_s17 + $0x8] sm:$0xff]  ;;  %s423_s23 = scalar_lea.vmem %s1836_s5, %s1382_s18 }
  0x16   : > { %483 = vmatpush.msra.mxu0 %v441_v2  ;;  %512 = vmatpush.msra.mxu1 %v450_v7  ;;  %v430_v12 = vld [vmem:[%s398_s21] sm:$0xff]  ;;  %v431_v17 = vld [vmem:[%s398_s21 + $0x8] sm:$0xff]  ;;  %v432_v18 = vld [vmem:[%s398_s21 + $0x10] sm:$0xff] }
  0x17   : > { %v444_v16 = vld [vmem:[%s418_s17] sm:$0xff]  ;;  %v433_v19 = vld [vmem:[%s398_s21 + $0x18] sm:$0xff]  ;;  %s1550_s17 = smov 8  }
  0x18   : > { %484 = vmatpush.msra.mxu0 %v440_v3  ;;  %513 = vmatpush.msra.mxu1 %v449_v9  ;;  %v1454_v21 = vld [vmem:[%s1628_s14] ss:$0 sm:$0xff]  ;;  %v1455_v26 = vld [vmem:[%s1628_s14 + $0x1] ss:$0 sm:$0xff] }
  0x19   : > { %v1669_v27 = vld [vmem:[%s388_s13] sm:$0xff] }
  0x1a   : > { %485 = vmatpush.msra.mxu0 %v439_v4  ;;  %514 = vmatpush.msra.mxu1 %v448_v11  ;;  %v1696_v37 = vld [vmem:[%s1651_s8] ss:$0 sm:$0xff]  ;;  %v1701_v41 = vld [vmem:[%s1651_s8 + $0x1] ss:$0 sm:$0xff] }
  0x1c   : > { %486 = vmatpush.msra.mxu0 %v438_v5  ;;  %515 = vmatpush.msra.mxu1 %v447_v13 }
  0x1e   : > { %487 = vmatpush.msra.mxu0 %v437_v8  ;;  %516 = vmatpush.msra.mxu1 %v446_v14 }
  0x20   : > { %488 = vmatpush.msra.mxu0 %v436_v10  ;;  %517 = vmatpush.msra.mxu1 %v445_v15 }
  0x21   : > { %1334 = vmatmul.msk.f32.vlgmr.msra.gmra.mxu0 %vm460_vm0, %v430_v12 }
  0x22   : > { %518 = vmatpush.msra.mxu1 %v444_v16 }
  0x23   : > { %1338 = vmatmul.msk.f32.vlgmr.msra.gmra.mxu1 %vm460_vm0, %v430_v12 }
  0x29   : > { %1335 = vmatmul.msk.f32.gmra.mxu0 %vm460_vm0, %v431_v17 }
  0x2b   : > { %1339 = vmatmul.msk.f32.gmra.mxu1 %vm460_vm0, %v431_v17 }
  0x31   : > { %1336 = vmatmul.msk.f32.gmra.mxu0 %vm460_vm0, %v432_v18 }
  0x33   : > { %1340 = vmatmul.msk.f32.gmra.mxu1 %vm460_vm0, %v432_v18 }
  0x39   : > { %1337 = vmatmul.msk.f32.gmra.mxu0 %vm460_vm0, %v433_v19 }
  0x3b   : > { %1341 = vmatmul.msk.f32.gmra.mxu1 %vm460_vm0, %v433_v19 }
  0x9e   : > { %v490_v20 = vpop.f32.mrf.mxu0 }
  0x9f   : > { %v1664_v25 = vadd.f32 %v1454_v21, %v490_v20 }
  0xa0   : > { %v520_v23 = vpop.f32.mrf.mxu1 }
  0xa1   : > { %v1671_v30 = vadd.f32 %v1455_v26, %v520_v23 }
  0xa6   : > { %v493_v22 = vpop.f32.mrf.mxu0 }
  0xa7   : > { %v1654_v24 = vadd.f32 %v1454_v21, %v493_v22 }
  0xa8   : > { %v523_v29 = vpop.f32.mrf.mxu1 }
  0xa9   : > { %669 = vrot.lane.b32.xlu2 %v1654_v24, %s1547_s10  ;;  %1342 = vmatpush.xpose.msk.msra.mxu3 %vm538_vm1, %v1654_v24  ;;  %v1673_v31 = vadd.f32 %v1455_v26, %v523_v29 }
  0xab   : > { %634 = vmatpush.msra.mxu2 %v1673_v31  ;;  %v1731_v13 = vpack.i.bf16 %v1671_v30, %v1673_v31 }
  0xad   : > { %1343 = vmatpush.xpose.msk.msra.mxu3 %vm538_vm1, %v1664_v25  ;;  %635 = vmatpush.msra.mxu2 %v1671_v30 }
  0xae   : > { %v496_v28 = vpop.f32.mrf.mxu0 }
  0xaf   : > { %v1681_v33 = vadd.f32 %v1454_v21, %v496_v28 }
  0xb0   : > { %1344 = vmatmul.msk.f32.vlgmr.msra.gmra.mxu3 %vm538_vm1, %v1669_v27  ;;  %v526_v55 = vpop.f32.mrf.mxu1 }
  0xb1   : > { %667 = vrot.lane.b32.xlu2 %v1664_v25, %s1547_s10  ;;  %v527_v57 = vadd.f32 %v1455_v26, %v526_v55 }
  0xb6   : > { %v499_v32 = vpop.f32.mrf.mxu0 }
  0xb7   : > { %v1683_v34 = vadd.f32 %v1454_v21, %v499_v32 }
  0xb8   : > { %v529_v56 = vpop.f32.mrf.mxu1 }
  0xb9   : > { %697 = vrot.lane.b32.xlu2 %v1681_v33, %s1547_s10  ;;  %1345 = vmatpush.xpose.msk.msrb.mxu3 %vm538_vm1, %v1683_v34  ;;  %v530_v58 = vadd.f32 %v1455_v26, %v529_v56 }
  0xbb   : > { %v1715_v59 = vpack.i.bf16 %v527_v57, %v530_v58 }
  0xbd   : > { %1346 = vmatpush.xpose.msk.msrb.mxu3 %vm538_vm1, %v1681_v33 }
  0xc0   : > { %1347 = vmatmul.msk.f32.vlgmr.msrb.gmra.mxu3 %vm538_vm1, %v1669_v27 }
  0xc1   : > { %657 = vmatpush.msra.mxu3 %v530_v58 }
  0xc3   : > { %658 = vmatpush.msra.mxu3 %v527_v57 }
 0x103   : > { %v670_v35 = vpop.permute.xlu2 %669 }
 0x104   : > { %1350 = vmatpush.xpose.msk.msrb.mxu2 %vm538_vm1, %v670_v35 }
 0x10b   : > { %v668_v36 = vpop.permute.xlu2 %667 }
 0x10c   : > { %1351 = vmatpush.xpose.msk.msrb.mxu2 %vm538_vm1, %v668_v36 }
 0x113   : > { %v698_v4 = vpop.permute.xlu2 %697 }
 0x133   : > { %v565_v38 = vpop.f32.mrf.mxu3 }
 0x134   : > { %v566_v39 = vadd.f32 %v1696_v37, %v565_v38 }
 0x136   : > { %v595_v40 = vsel %vm594_vm2, %v566_v39, -inf }
 0x137   : > { %596 = vmax.xlane.f32.xlu0 %v595_v40 }
 0x143   : > { %v591_v42 = vpop.f32.mrf.mxu3 }
 0x144   : > { %v592_v43 = vadd.f32 %v1701_v41, %v591_v42 }
 0x146   : > { %v598_v44 = vsel %vm594_vm2, %v592_v43, -inf }
 0x147   : > { %599 = vmax.xlane.f32.xlu0 %v598_v44 }
 0x15b   : > { %665 = vrot.lane.b32.xlu0 %v1669_v27, %s1547_s10 }
 0x163   : > { %1430 = vrot.lane.b32.xlu0 %v1715_v59, %s1547_s10 }
 0x1aa   : > { %v597_v45 = vpop.xlane.xlu0 %596 }
 0x1ab   : > { %v601_v46 = vsub.f32 %v566_v39, %v597_v45 }
 0x1ad   : > { %v603_v47 = vmul.f32 1.442695, %v601_v46 }
 0x1af   : > { %1459 = vpow2.f32 %v603_v47 }
 0x1b5   : > { %v1460_v48 = vpop.eup %1459 }
 0x1b6   : > { %v607_v49 = vsel %vm594_vm2, %v1460_v48, 0.0 }
 0x1b7   : > { %608 = vadd.xlane.f32.xlu1 %v607_v49 }
 0x1ba   : > { %v600_v50 = vpop.xlane.xlu0 %599 }
 0x1bb   : > { %v602_v51 = vsub.f32 %v592_v43, %v600_v50 }
 0x1bd   : > { %v605_v52 = vmul.f32 1.442695, %v602_v51 }
 0x1bf   : > { %1461 = vpow2.f32 %v605_v52 }
 0x1c5   : > { %v1462_v53 = vpop.eup %1461 }
 0x1c6   : > { %v610_v54 = vsel %vm594_vm2, %v1462_v53, 0.0 }
 0x1c7   : > { %611 = vadd.xlane.f32.xlu1 %v610_v54 }
 0x1cd   : > { %v666_v63 = vpop.permute.xlu0 %665 }
 0x1d5   : > { %v1431_v5 = vpop.permute.xlu0 %1430 }
 0x1d6   : > { %v1433_v6 = vunpack.i.h.bf16 %v1431_v5  ;;  %v1432_v7 = vunpack.i.l.bf16 %v1431_v5 }
 0x1e0   : > { %699 = vrot.lane.b32.xlu1 %v1683_v34, %s1547_s10 }
 0x1e8   : > { %824 = vrot.lane.b32.xlu1 %v1654_v24, %s1548_s15 }
 0x1f0   : > { %852 = vrot.lane.b32.xlu1 %v1681_v33, %s1548_s15 }
 0x22a   : > { %v609_v60 = vpop.xlane.xlu1 %608 }
 0x22b   : > { %1463 = vrcp.f32 %v609_v60 }
 0x231   : > { %v1464_v61 = vpop.eup %1463 }
 0x232   : > { %v615_v62 = vmul.f32 %v1464_v61, %v1460_v48 }
 0x234   : > { %1348 = vmatmul.msk.f32.vlgmr.msra.gmra.mxu2 %vm594_vm2, %v615_v62 }
 0x23a   : > { %v612_v0 = vpop.xlane.xlu1 %611 }
 0x23b   : > { %1465 = vrcp.f32 %v612_v0 }
 0x23c   : > { %1352 = vmatmul.msk.f32.vlgmr.msrb.gmra.mxu2 %vm538_vm1, %v666_v63 }
 0x241   : > { %v1466_v1 = vpop.eup %1465 }
 0x242   : > { %v616_v2 = vmul.f32 %v1466_v1, %v1462_v53 }
 0x244   : > { %1349 = vmatmul.msk.f32.vlgmr.msra.gmra.mxu3 %vm594_vm2, %v616_v2 }
 0x252   : > { %v700_v3 = vpop.permute.xlu1 %699 }
 0x253   : > { %1353 = vmatpush.xpose.msk.msrb.mxu3 %vm538_vm1, %v700_v3 }
 0x257   : > { %1354 = vmatpush.xpose.msk.msrb.mxu3 %vm538_vm1, %v698_v4 }
 0x25a   : > { %1355 = vmatmul.msk.f32.vlgmr.msrb.gmra.mxu3 %vm538_vm1, %v666_v63  ;;  %v825_v28 = vpop.permute.xlu1 %824 }
 0x25b   : > { %803 = vmatpush.msra.mxu3 %v1432_v7 }
 0x25d   : > { %804 = vmatpush.msra.mxu3 %v1433_v6 }
 0x2b7   : > { %v637_v8 = vpop.f32.mrf.mxu2 }
 0x2b8   : > { %663 = vst.msk [vmem:[#allocation2] sm:$0xff] %vm538_vm1, %v637_v8 }
 0x2bf   : > { %v694_v9 = vpop.f32.mrf.mxu2 }
 0x2c0   : > { %v695_v10 = vadd.f32 %v1696_v37, %v694_v9 }
 0x2c2   : > { %v725_v11 = vsel %vm594_vm2, %v695_v10, -inf }
 0x2c3   : > { %726 = vmax.xlane.f32.xlu2 %v725_v11 }
 0x2c7   : > { %v660_v12 = vpop.f32.mrf.mxu3 }
 0x2c8   : > { %664 = vst.msk [vmem:[#allocation2 + $0x8] sm:$0xff] %vm538_vm1, %v660_v12 }
 0x2db   : > { %1425 = vrot.lane.b32.xlu2 %v1731_v13, %s1547_s10 }
 0x2dd   : > { %v722_v14 = vpop.f32.mrf.mxu3 }
 0x2de   : > { %v723_v15 = vadd.f32 %v1701_v41, %v722_v14 }
 0x2e0   : > { %v728_v16 = vsel %vm594_vm2, %v723_v15, -inf }
 0x2e1   : > { %729 = vmax.xlane.f32.xlu0 %v728_v16 }
 0x2e3   : > { %822 = vrot.lane.b32.xlu2 %v1664_v25, %s1548_s15 }
 0x2eb   : > { %820 = vrot.lane.b32.xlu2 %v1669_v27, %s1548_s15 }
 0x2f3   : > { %854 = vrot.lane.b32.xlu2 %v1683_v34, %s1548_s15 }
 0x2f5   : > { %975 = vrot.lane.b32.xlu0 %v1654_v24, %s1549_s16 }
 0x2fb   : > { %973 = vrot.lane.b32.xlu2 %v1664_v25, %s1549_s16 }
 0x303   : > { %1003 = vrot.lane.b32.xlu2 %v1681_v33, %s1549_s16  ;;  %v853_v33 = vpop.permute.xlu1 %852 }
 0x336   : > { %v727_v17 = vpop.xlane.xlu2 %726 }
 0x337   : > { %v731_v18 = vsub.f32 %v695_v10, %v727_v17 }
 0x339   : > { %v733_v19 = vmul.f32 1.442695, %v731_v18 }
 0x33b   : > { %1467 = vpow2.f32 %v733_v19 }
 0x33e   : > { %v1426_v20 = vpop.permute.xlu2 %1425 }
 0x33f   : > { %v1427_v21 = vunpack.i.l.bf16 %v1426_v20  ;;  %v1428_v23 = vunpack.i.h.bf16 %v1426_v20 }
 0x341   : > { %v1468_v22 = vpop.eup %1467  ;;  %772 = vmatpush.msra.mxu2 %v1427_v21 }
 0x342   : > { %v737_v26 = vsel %vm594_vm2, %v1468_v22, 0.0 }
 0x343   : > { %738 = vadd.xlane.f32.xlu1 %v737_v26  ;;  %773 = vmatpush.msra.mxu2 %v1428_v23 }
 0x345   : > { %1358 = vmatpush.xpose.msk.msrb.mxu2 %vm538_vm1, %v825_v28 }
 0x346   : > { %v823_v24 = vpop.permute.xlu2 %822 }
 0x349   : > { %1359 = vmatpush.xpose.msk.msrb.mxu2 %vm538_vm1, %v823_v24 }
 0x34e   : > { %v821_v25 = vpop.permute.xlu2 %820 }
 0x354   : > { %v730_v29 = vpop.xlane.xlu0 %729 }
 0x355   : > { %v732_v30 = vsub.f32 %v723_v15, %v730_v29 }
 0x356   : > { %v855_v31 = vpop.permute.xlu2 %854 }
 0x357   : > { %v735_v32 = vmul.f32 1.442695, %v732_v30  ;;  %1361 = vmatpush.xpose.msk.msrb.mxu3 %vm538_vm1, %v855_v31 }
 0x359   : > { %1469 = vpow2.f32 %v735_v32 }
 0x35b   : > { %1362 = vmatpush.xpose.msk.msrb.mxu3 %vm538_vm1, %v853_v33 }
 0x35c   : > { %1005 = vrot.lane.b32.xlu1 %v1683_v34, %s1549_s16 }
 0x35e   : > { %v974_v43 = vpop.permute.xlu2 %973 }
 0x35f   : > { %v1470_v35 = vpop.eup %1469 }
 0x360   : > { %v740_v36 = vsel %vm594_vm2, %v1470_v35, 0.0 }
 0x361   : > { %741 = vadd.xlane.f32.xlu0 %v740_v36 }
 0x367   : > { %v976_v42 = vpop.permute.xlu0 %975 }
 0x375   : > { %971 = vrot.lane.b32.xlu0 %v1669_v27, %s1549_s16  ;;  %v1004_v27 = vpop.permute.xlu2 %1003 }
 0x3b6   : > { %v739_v38 = vpop.xlane.xlu1 %738 }
 0x3b7   : > { %1471 = vrcp.f32 %v739_v38 }
 0x3bd   : > { %v1472_v39 = vpop.eup %1471 }
 0x3be   : > { %v745_v40 = vmul.f32 %v1472_v39, %v1468_v22 }
 0x3c0   : > { %1356 = vmatmul.msk.f32.vlgmr.msra.gmra.mxu2 %vm594_vm2, %v745_v40 }
 0x3c1   : > { %1366 = vmatpush.xpose.msk.msra.mxu2 %vm538_vm1, %v976_v42 }
 0x3c5   : > { %1367 = vmatpush.xpose.msk.msra.mxu2 %vm538_vm1, %v974_v43 }
 0x3c8   : > { %1360 = vmatmul.msk.f32.vlgmr.msrb.gmra.mxu2 %vm538_vm1, %v821_v25 }
 0x3ce   : > { %v1006_v46 = vpop.permute.xlu1 %1005 }
 0x3d4   : > { %v742_v34 = vpop.xlane.xlu0 %741 }
 0x3d5   : > { %1473 = vrcp.f32 %v742_v34 }
 0x3db   : > { %v1474_v44 = vpop.eup %1473 }
 0x3dc   : > { %v746_v45 = vmul.f32 %v1474_v44, %v1470_v35 }
 0x3de   : > { %1357 = vmatmul.msk.f32.vlgmr.msra.gmra.mxu3 %vm594_vm2, %v746_v45 }
 0x3df   : > { %1369 = vmatpush.xpose.msk.msra.mxu3 %vm538_vm1, %v1006_v46 }
 0x3e3   : > { %1370 = vmatpush.xpose.msk.msra.mxu3 %vm538_vm1, %v1004_v27 }
 0x3e6   : > { %1363 = vmatmul.msk.f32.vlgmr.msrb.gmra.mxu3 %vm538_vm1, %v821_v25 }
 0x3e7   : > { %v972_v47 = vpop.permute.xlu0 %971 }
 0x3e8   : > { %1368 = vmatmul.msk.f32.vlgmr.msra.gmra.mxu2 %vm538_vm1, %v972_v47 }
 0x3ee   : > { %1371 = vmatmul.msk.f32.vlgmr.msra.gmra.mxu3 %vm538_vm1, %v972_v47 }
 0x443   : > { %v775_v48 = vpop.f32.mrf.mxu2 }
 0x44b   : > { %v849_v49 = vpop.f32.mrf.mxu2 }
 0x44c   : > { %v850_v50 = vadd.f32 %v1696_v37, %v849_v49  ;;  %v455_v49 = vld [vmem:[%s423_s23 + $0x18] sm:$0xff] }
 0x44d   : > { %1144 = vmatpush.msrb.mxu2 %v455_v49 }
 0x44e   : > { %v880_v51 = vsel %vm594_vm2, %v850_v50, -inf }
 0x44f   : > { %881 = vmax.xlane.f32.xlu0 %v880_v51  ;;  %v453_v51 = vld [vmem:[%s423_s23 + $0x8] sm:$0xff] }
 0x461   : > { %v1771_v52 = vpop.f32.mrf.mxu3 }
 0x469   : > { %v877_v53 = vpop.f32.mrf.mxu3 }
 0x46a   : > { %v878_v54 = vadd.f32 %v1701_v41, %v877_v53 }
 0x46b   : > { %v1000_v55 = vpop.f32.mrf.mxu2 }
 0x46c   : > { %v1001_v56 = vadd.f32 %v1696_v37, %v1000_v55  ;;  %v883_v57 = vsel %vm594_vm2, %v878_v54, -inf }
 0x46d   : > { %884 = vmax.xlane.f32.xlu1 %v883_v57 }
 0x46e   : > { %v1031_v58 = vsel %vm594_vm2, %v1001_v56, -inf }
 0x46f   : > { %1032 = vmax.xlane.f32.xlu2 %v1031_v58  ;;  %v1458_v58 = vld [vmem:[%s1628_s14 + $0x2] ss:$0 sm:$0xff] }
 0x471   : > { %v1028_v60 = vpop.f32.mrf.mxu3 }
 0x472   : > { %v1029_v61 = vadd.f32 %v1701_v41, %v1028_v60 }
 0x474   : > { %v1034_v62 = vsel %vm594_vm2, %v1029_v61, -inf }
 0x475   : > { %1035 = vmax.xlane.f32.xlu0 %v1034_v62 }
 0x487   : > { %1435 = vrot.lane.b32.xlu2 %v1731_v13, %s1548_s15 }
 0x489   : > { %1440 = vrot.lane.b32.xlu0 %v1715_v59, %s1548_s15 }
 0x4c2   : > { %v882_v63 = vpop.xlane.xlu0 %881 }
 0x4c3   : > { %v886_v37 = vsub.f32 %v850_v50, %v882_v63  ;;  %v454_v50 = vld [vmem:[%s423_s23 + $0x10] sm:$0xff] }
 0x4c4   : > { %1145 = vmatpush.msrb.mxu2 %v454_v50 }
 0x4c5   : > { %v888_v0 = vmul.f32 1.442695, %v886_v37 }
 0x4c6   : > { %1146 = vmatpush.msrb.mxu2 %v453_v51 }
 0x4c7   : > { %1475 = vpow2.f32 %v888_v0 }
 0x4cd   : > { %v1476_v1 = vpop.eup %1475 }
 0x4ce   : > { %v892_v2 = vsel %vm594_vm2, %v1476_v1, 0.0 }
 0x4cf   : > { %893 = vadd.xlane.f32.xlu1 %v892_v2 }
 0x4e0   : > { %v885_v3 = vpop.xlane.xlu1 %884 }
 0x4e1   : > { %v887_v4 = vsub.f32 %v878_v54, %v885_v3 }
 0x4e2   : > { %v1033_v41 = vpop.xlane.xlu2 %1032 }
 0x4e3   : > { %v890_v5 = vmul.f32 1.442695, %v887_v4  ;;  %v1037_v6 = vsub.f32 %v1001_v56, %v1033_v41 }
 0x4e5   : > { %1477 = vpow2.f32 %v890_v5  ;;  %v1039_v7 = vmul.f32 1.442695, %v1037_v6 }
 0x4e7   : > { %1479 = vpow2.f32 %v1039_v7 }
 0x4e8   : > { %v1036_v8 = vpop.xlane.xlu0 %1035 }
 0x4e9   : > { %v1038_v9 = vsub.f32 %v1029_v61, %v1036_v8 }
 0x4ea   : > { %v1436_v10 = vpop.permute.xlu2 %1435 }
 0x4eb   : > { %v1478_v11 = vpop.eup %1477  ;;  %v1041_v12 = vmul.f32 1.442695, %v1038_v9  ;;  %v1437_v14 = vunpack.i.l.bf16 %v1436_v10  ;;  %v1438_v17 = vunpack.i.h.bf16 %v1436_v10 }
 0x4ec   : > { %v895_v15 = vsel %vm594_vm2, %v1478_v11, 0.0 }
 0x4ed   : > { %v1480_v16 = vpop.eup %1479  ;;  %1481 = vpow2.f32 %v1041_v12  ;;  %925 = vmatpush.msrb.mxu0 %v1437_v14  ;;  %896 = vadd.xlane.f32.xlu0 %v895_v15 }
 0x4ee   : > { %v1043_v18 = vsel %vm594_vm2, %v1480_v16, 0.0 }
 0x4ef   : > { %926 = vmatpush.msrb.mxu0 %v1438_v17  ;;  %1044 = vadd.xlane.f32.xlu1 %v1043_v18 }
 0x4f3   : > { %v1482_v19 = vpop.eup %1481 }
 0x4f4   : > { %v1046_v20 = vsel %vm594_vm2, %v1482_v19, 0.0 }
 0x4f5   : > { %1047 = vadd.xlane.f32.xlu2 %v1046_v20 }
 0x4fb   : > { %v1441_v21 = vpop.permute.xlu0 %1440 }
 0x4fc   : > { %v1442_v22 = vunpack.i.l.bf16 %v1441_v21  ;;  %v1443_v23 = vunpack.i.h.bf16 %v1441_v21 }
 0x4fe   : > { %954 = vmatpush.msrb.mxu1 %v1442_v22 }
 0x500   : > { %955 = vmatpush.msrb.mxu1 %v1443_v23 }
 0x501   : > { %1450 = vrot.lane.b32.xlu0 %v1715_v59, %s1549_s16 }
 0x508   : > { %1445 = vrot.lane.b32.xlu1 %v1731_v13, %s1549_s16 }
 0x510   : > { %811 = vrot.lane.b32.xlu1 %v775_v48, %s1550_s17 }
 0x542   : > { %v894_v26 = vpop.xlane.xlu1 %893 }
 0x543   : > { %1483 = vrcp.f32 %v894_v26 }
 0x549   : > { %v1484_v28 = vpop.eup %1483 }
 0x54a   : > { %v900_v24 = vmul.f32 %v1484_v28, %v1476_v1 }
 0x54c   : > { %1364 = vmatmul.msk.f32.vlgmr.msrb.gmra.mxu0 %vm594_vm2, %v900_v24 }
 0x560   : > { %v897_v25 = vpop.xlane.xlu0 %896 }
 0x561   : > { %1485 = vrcp.f32 %v897_v25 }
 0x562   : > { %v1045_v59 = vpop.xlane.xlu1 %1044 }
 0x567   : > { %v1486_v29 = vpop.eup %1485 }
 0x568   : > { %v901_v30 = vmul.f32 %v1486_v29, %v1478_v11  ;;  %v1048_v31 = vpop.xlane.xlu2 %1047 }
 0x569   : > { %1487 = vrcp.f32 %v1048_v31 }
 0x56a   : > { %1365 = vmatmul.msk.f32.vlgmr.msrb.gmra.mxu1 %vm594_vm2, %v901_v30  ;;  %1489 = vrcp.f32 %v1045_v59 }
 0x56f   : > { %v1488_v13 = vpop.eup %1487 }
 0x570   : > { %v1052_v36 = vmul.f32 %v1488_v13, %v1482_v19  ;;  %v1490_v39 = vpop.eup %1489 }
 0x571   : > { %v1051_v43 = vmul.f32 %v1490_v39, %v1480_v16 }
 0x573   : > { %v1451_v32 = vpop.permute.xlu0 %1450 }
 0x574   : > { %v1452_v33 = vunpack.i.l.bf16 %v1451_v32  ;;  %v1453_v35 = vunpack.i.h.bf16 %v1451_v32 }
 0x576   : > { %1105 = vmatpush.msra.mxu1 %v1452_v33 }
 0x578   : > { %1106 = vmatpush.msra.mxu1 %v1453_v35 }
 0x579   : > { %1373 = vmatmul.msk.f32.vlgmr.msra.gmra.mxu1 %vm594_vm2, %v1052_v36 }
 0x57a   : > { %v1446_v38 = vpop.permute.xlu1 %1445 }
 0x57b   : > { %v1447_v40 = vunpack.i.l.bf16 %v1446_v38  ;;  %v1448_v42 = vunpack.i.h.bf16 %v1446_v38 }
 0x57d   : > { %1076 = vmatpush.msra.mxu0 %v1447_v40 }
 0x57f   : > { %1077 = vmatpush.msra.mxu0 %v1448_v42 }
 0x580   : > { %1372 = vmatmul.msk.f32.vlgmr.msra.gmra.mxu0 %vm594_vm2, %v1051_v43 }
 0x582   : > { %v812_v34 = vpop.permute.xlu1 %811 }
 0x583   : > { %818 = vst.msk [vmem:[#allocation2] sm:$0xff] %vm817_vm3, %v812_v34 }
 0x5c9   : > { %v928_v44 = vpop.f32.mrf.mxu0 }
 0x5ca   : > { %962 = vrot.lane.b32.xlu0 %v928_v44, %s1551_s19 }
 0x5d2   : > { %813 = vrot.lane.b32.xlu0 %v1771_v52, %s1550_s17  ;;  %v452_v52 = vld [vmem:[%s423_s23] sm:$0xff] }
 0x5d3   : > { %1147 = vmatpush.msrb.mxu2 %v452_v52 }
 0x5e7   : > { %v957_v45 = vpop.f32.mrf.mxu1 }
 0x5f6   : > { %v1108_v46 = vpop.f32.mrf.mxu1 }
 0x5f7   : > { %1115 = vrot.lane.b32.xlu0 %v1108_v46, %s1552_s20 }
 0x5fd   : > { %v1079_v27 = vpop.f32.mrf.mxu0 }
 0x5fe   : > { %1113 = vrot.lane.b32.xlu1 %v1079_v27, %s1552_s20 }
 0x606   : > { %964 = vrot.lane.b32.xlu1 %v957_v45, %s1551_s19 }
 0x63c   : > { %v963_v47 = vpop.permute.xlu0 %962 }
 0x63d   : > { %969 = vst.msk [vmem:[#allocation2] sm:$0xff] %vm968_vm4, %v963_v47 }
 0x644   : > { %v814_v48 = vpop.permute.xlu0 %813 }
 0x645   : > { %819 = vst.msk [vmem:[#allocation2 + $0x8] sm:$0xff] %vm817_vm3, %v814_v48 }
 0x669   : > { %v1116_v56 = vpop.permute.xlu0 %1115 }
 0x670   : > { %v1114_v53 = vpop.permute.xlu1 %1113 }
 0x671   : > { %1120 = vst.msk [vmem:[#allocation2] sm:$0xff] %vm1119_vm5, %v1114_v53 }
 0x678   : > { %v965_v54 = vpop.permute.xlu1 %964  ;;  %v1122_v55 = vld [vmem:[#allocation2] sm:$0xff] }
 0x679   : > { %970 = vst.msk [vmem:[#allocation2 + $0x8] sm:$0xff] %vm968_vm4, %v965_v54  ;;  %1374 = vmatmul.msk.f32.vlgmr.msrb.gmra.mxu2 %vm1125_vm6, %v1122_v55 }
 0x67a   : > { %1121 = vst.msk [vmem:[#allocation2 + $0x8] sm:$0xff] %vm1119_vm5, %v1116_v56 }
 0x681   : > { %v1123_v57 = vld [vmem:[#allocation2 + $0x8] sm:$0xff] }
 0x682   : > { %1375 = vmatmul.msk.f32.gmra.mxu2 %vm1125_vm6, %v1123_v57 }
 0x6fc   : > { %v1149_v60 = vpop.f32.mrf.mxu2 }
 0x6fd   : > { %v1150_v61 = vadd.f32 %v1458_v58, %v1149_v60 }
 0x702   : > { %1158 = sbr.rel (%p1376_p5) target bundleno = 1801 (0x709), region = 52 }
 0x705   : > { %v1152_v62 = vpop.f32.mrf.mxu2 }
 0x706   : > { %v1153_v63 = vadd.f32 %v1458_v58, %v1152_v62 }
 0x707   : > { %1159 = vst.msk [vmem:[#allocation3] sm:$0xff] %vm1125_vm6, %v1150_v61 }
 0x708   : > { %1160 = vst.msk [vmem:[#allocation3 + $0x8] sm:$0xff] %vm1125_vm6, %v1153_v63 }
 0x709 PF: > { %p1377_p6 = scmp.le.s32.totalorder %s1537_s24, 0 }
 0x70b   : > { %1164 = sbr.rel (%p1377_p6) target bundleno = 1813 (0x715), region = 56 }
 0x710   : > { %v1165_v37 = vld [vmem:[#allocation3] sm:$0xff]  ;;  %v1166_v0 = vld [vmem:[#allocation3 + $0x8] sm:$0xff] }
 0x711   : > { %v1167_v1 = vadd.f32 %v1165_v37, %v1150_v61  ;;  %v1168_v2 = vadd.f32 %v1166_v0, %v1153_v63 }
 0x713   : > { %1169 = vst.msk [vmem:[#allocation3] sm:$0xff] %vm1125_vm6, %v1167_v1 }
 0x714   : > { %1170 = vst.msk [vmem:[#allocation3 + $0x8] sm:$0xff] %vm1125_vm6, %v1168_v2 }
 0x715 PF: > { %p1390_p7 = scmp.eq.s32.totalorder %s1319_s27, 1  ;;  %s1181_s18 = sshll.u32 %s1838_s7, 4  ;;  %s1182_s18 = int_to_ptr.hbm [resolvable:$true] %s1181_s18 }
 0x716   : > { %s1553_s30 = smov [#allocation3]   ;;  %s1554_s24 = smov 128  }
 0x717   : > { %s1179_s8 = sshll.u32 %s1553_s30, 4  ;;  %s1180_s8 = int_to_ptr.vmem [resolvable:$true] %s1179_s8 }
 0x718   : > { %1387 = dma.vmem_to_hbm [thread:$0]  (%p1390_p7), %s1180_s8, 256, %s1182_s18, [#allocation4], %s1554_s24, %s1554_s24, %s1550_s17  }
 0x719   : > { %1532 = dma.done.wait (%p1390_p7), [#allocation4], 256  }
 0x71a   : > { %1534 = vsyncadd (%p1390_p7), [#allocation4], 4294967040 }
 0x71b PF: > { %s18_s26 = sadd.s32 1, %s1545_s26   ;;  %s1839_s24 = smov %s1541_s25 }
 0x71c   : > { %p15_p8 = scmp.ge.s32.totalorder %s18_s26, 4   ;;  %s1840_s25 = smov %s1842_s28 }
 0x71e   :  { %17 = sbr.rel (!%p15_p8) target bundleno = 2 (0x2), region = 102 }
 0x723   :  { %1198 = vsyncpa [#allocation4], 1 }
 0x724   :  { %1200 = vsyncpa [#allocation4 + $0x1], 1 }

</bundles_post_ra>
